<compile_context>
chip_gen: v7x
topology: tpu7x:2x2x1
jax: 0.10.0
libtpu: 0.0.40
codegen_flags: <defaults>
</compile_context>

<pallas_src>
import jax
import jax.numpy as jnp
from jax import lax
from jax.experimental import pallas as pl
from jax.experimental.pallas import tpu as pltpu


def _lstm_kernel(gates_in_ref, w_hh_ref, w_proj_ref, out_ref):
    # gates_in_ref: (T, TB, 4H) f32   x[t]*w_ih + (b_ih+b_hh), g-lanes pre-scaled x2
    # w_hh_ref:     (4H, 4H)    bf16  rows [0,H) = weight_hh.T (g-cols x2), rows [H,4H) = 0
    # w_proj_ref:   (1, 4H)     f32   lanes [0,H) = proj.weight, rest = 0
    # out_ref:      (1, TB)     f32   batch on lanes (lane-dense store)
    T, TB, G = gates_in_ref.shape
    H = G // 4

    w_hh = w_hh_ref[...]                      # (4H, 4H) bf16, resident across the recurrence

    def step(t, carry):
        # h, c are lane-packed at full width (TB, 4H); only lanes [0, H) are
        # meaningful.  Junk lanes stay bounded (sigmoid/tanh outputs) and are
        # annihilated by the zero rows of w_hh / zero lanes of w_proj, so no
        # lane slicing sits on the serial critical path.
        h, c = carry
        gates = gates_in_ref[t] + jnp.dot(h.astype(jnp.bfloat16), w_hh,
                                          preferred_element_type=jnp.float32)
        # Single EUP pass: g-gate pre-activation was scaled by 2 at weight prep,
        # so tanh(z) = 2*sigmoid(2z) - 1 comes out of the same sigmoid.
        act = jax.nn.sigmoid(gates)
        i_g = act                                          # lanes [0,H): i
        f_g = pltpu.roll(act, shift=3 * H, axis=1)         # lanes [0,H): f
        g_g = 2.0 * pltpu.roll(act, shift=2 * H, axis=1) - 1.0   # lanes [0,H): tanh(g)
        o_g = pltpu.roll(act, shift=1 * H, axis=1)         # lanes [0,H): o
        c_new = f_g * c + i_g * g_g
        h_new = o_g * jnp.tanh(c_new)
        return h_new, c_new

    h0 = jnp.zeros((TB, G), jnp.float32)
    c0 = jnp.zeros((TB, G), jnp.float32)
    unroll = True if T <= 16 else 8           # guard full unroll for large T
    h_last, _ = lax.fori_loop(0, T, step, (h0, c0), unroll=unroll)

    # Lane-dense epilogue (off the serial path): (1,4H) x (TB,4H) contracted on
    # the last dims -> (1, TB).  Zero lanes [H,4H) of w_proj kill junk lanes.
    out_ref[...] = lax.dot_general(
        w_proj_ref[...], h_last,
        dimension_numbers=(((1,), (1,)), ((), ())),
        preferred_element_type=jnp.float32)


def lstm_model_forward(x, params, *, batch_tile=None, interpret=False):
    """x: (batch, seq) float32 -> (batch, 1) float32 (matches LSTMModel.forward)."""
    B, T = x.shape
    H = params["w_hh"].shape[1]
    G = 4 * H

    # --- one-time weight prep (outside the kernel) --------------------------
    # Fold the x2 scale for the g gate (lanes [2H, 3H)) into all of its
    # pre-activation contributions so the kernel only needs sigmoid.
    gate_scale = jnp.ones((G,), jnp.float32).at[2 * H:3 * H].set(2.0)
    w_ih_row = params["w_ih"][:, 0].astype(jnp.float32) * gate_scale          # (G,)
    b_row = (params["b_ih"] + params["b_hh"]).astype(jnp.float32) * gate_scale  # (G,)
    # Zero-pad recurrent / projection weights so the kernel can keep the hidden
    # state lane-packed at width 4H (junk lanes multiply zeros).  The x2 scale
    # is exact in bf16 (power of two); zero rows stay exactly zero.
    w_hh_p = jnp.zeros((G, G), jnp.float32).at[:H, :].set(
        params["w_hh"].T.astype(jnp.float32))
    w_hh_p = (w_hh_p * gate_scale[None, :]).astype(jnp.bfloat16)               # (G, G) bf16
    w_proj_p = jnp.zeros((1, G), jnp.float32).at[:, :H].set(
        params["w_proj"].astype(jnp.float32))
    b_proj = params["b_proj"].astype(jnp.float32)                              # (1,)

    # --- pad batch to full f32 sublanes and the chosen batch tile -----------
    B_pad = max(8, -(-B // 8) * 8)
    if batch_tile is None:
        # Tunable: raise for large batches on v5e/v6e (fewer grid steps), size
        # so v7x gets >= 2 grid steps; 128 keeps vreg pressure in check.
        batch_tile = min(B_pad, 128)
    B_pad = -(-B_pad // batch_tile) * batch_tile

    # Input projection hoisted fully off the serial chain into XLA, producing a
    # lane-dense (T, B_pad, 4H) slab (no width-1 lane dim in the kernel input).
    x_tb = jnp.zeros((T, B_pad), jnp.float32).at[:, :B].set(x.T.astype(jnp.float32))
    gates_in = x_tb[:, :, None] * w_ih_row[None, None, :] + b_row[None, None, :]

    grid = (B_pad // batch_tile,)

    out = pl.pallas_call(
        _lstm_kernel,
        out_shape=jax.ShapeDtypeStruct((1, B_pad), jnp.float32),
        grid_spec=pltpu.PrefetchScalarGridSpec(
            num_scalar_prefetch=0,
            grid=grid,
            in_specs=[
                pl.BlockSpec((T, batch_tile, G), lambda bb: (0, bb, 0)),
                pl.BlockSpec((G, G), lambda bb: (0, 0)),
                pl.BlockSpec((1, G), lambda bb: (0, 0)),
            ],
            out_specs=pl.BlockSpec((1, batch_tile), lambda bb: (0, bb)),
        ),
        compiler_params=pltpu.CompilerParams(
            dimension_semantics=("parallel",)),
        interpret=interpret,
    )(gates_in, w_hh_p, w_proj_p)

    # Lane-dense kernel output -> (B, 1); +b_proj folded here (scalar, free).
    return out[0, :B].reshape(B, 1) + b_proj


def _reference_forward(x, params):
    """Pure-JAX reference mirroring PyTorch nn.LSTM + Linear semantics (f32)."""
    B, T = x.shape
    H = params["w_hh"].shape[1]
    h = jnp.zeros((B, H), jnp.float32)
    c = jnp.zeros((B, H), jnp.float32)
    for t in range(T):
        x_t = x[:, t:t + 1]                                       # (B, 1)
        gates = (x_t @ params["w_ih"].T + params["b_ih"]
                 + h @ params["w_hh"].T + params["b_hh"])         # (B, 4H)
        i = jax.nn.sigmoid(gates[:, 0 * H:1 * H])
        f = jax.nn.sigmoid(gates[:, 1 * H:2 * H])
        g = jnp.tanh(gates[:, 2 * H:3 * H])
        o = jax.nn.sigmoid(gates[:, 3 * H:4 * H])
        c = f * c + i * g
        h = o * jnp.tanh(c)
    return h @ params["w_proj"].T + params["b_proj"]


def init_params(key, hid_size):
    """Deterministic init matching PyTorch parameter shapes (uniform +-1/sqrt(H))."""
    k = 1.0 / jnp.sqrt(jnp.float32(hid_size))
    keys = jax.random.split(key, 6)
    u = lambda kk, shape: jax.random.uniform(kk, shape, jnp.float32, -k, k)
    return {
        "w_ih": u(keys[0], (4 * hid_size, 1)),         # lstm.weight_ih_l0
        "w_hh": u(keys[1], (4 * hid_size, hid_size)),  # lstm.weight_hh_l0
        "b_ih": u(keys[2], (4 * hid_size,)),           # lstm.bias_ih_l0
        "b_hh": u(keys[3], (4 * hid_size,)),           # lstm.bias_hh_l0
        "w_proj": u(keys[4], (1, hid_size)),           # proj.weight
        "b_proj": u(keys[5], (1,)),                    # proj.bias
    }


if __name__ == "__main__":
    batch, seq, hid = 2, 8, 32

    key = jax.random.PRNGKey(0)
    k_x, k_p = jax.random.split(key)
    x = jax.random.normal(k_x, (batch, seq), jnp.float32)
    params = init_params(k_p, hid)

    out = jax.block_until_ready(lstm_model_forward(x, params))
    ref = _reference_forward(x, params)

    assert out.shape == (batch, 1)
    # bf16 recurrent matmul (f32 accumulation): tolerance relaxed vs the f32 kernel.
    assert jnp.allclose(out, ref, atol=2e-2, rtol=2e-2), (out, ref)

    print("KERNEL_OK")
</pallas_src>

<mosaic_0001>
module attributes {stable_mosaic.version = 11 : i64} {
  func.func @_lstm_kernel(%arg0: i32, %arg1: memref<8x8x128xf32, #tpu.memory_space<vmem>>, %arg2: memref<128x128xbf16, #tpu.memory_space<vmem>>, %arg3: memref<1x128xf32, #tpu.memory_space<vmem>>, %arg4: memref<1x8xf32, #tpu.memory_space<vmem>>) attributes {dimension_semantics = [#tpu.dimension_semantics<parallel>], iteration_bounds = array<i64: 1>, scalar_prefetch = 0 : i64, scratch_operands = 0 : i64, tpu.core_type = #tpu.core_type<tc>, window_params = [{transform_indices = @transform_0, window_bounds = array<i64: 8, 8, 128>}, {pipeline_mode = #tpu.pipeline_mode<synchronous>, transform_indices = @transform_1, window_bounds = array<i64: 128, 128>}, {pipeline_mode = #tpu.pipeline_mode<synchronous>, transform_indices = @transform_2, window_bounds = array<i64: 1, 128>}, {transform_indices = @transform_3, window_bounds = array<i64: 1, 8>}]} {
    %c0 = arith.constant 0 : index
    %c0_0 = arith.constant 0 : index
    %0 = vector.load %arg2[%c0, %c0_0] : memref<128x128xbf16, #tpu.memory_space<vmem>>, vector<128x128xbf16>
    %cst = arith.constant 0.000000e+00 : f32
    %1 = vector.broadcast %cst : f32 to vector<8x128xf32>
    %cst_1 = arith.constant 0.000000e+00 : f32
    %2 = vector.broadcast %cst_1 : f32 to vector<8x128xf32>
    %c0_i32 = arith.constant 0 : i32
    %3 = arith.index_cast %c0_i32 : i32 to index
    %c0_2 = arith.constant 0 : index
    %c0_3 = arith.constant 0 : index
    %4 = vector.load %arg1[%3, %c0_2, %c0_3] : memref<8x8x128xf32, #tpu.memory_space<vmem>>, vector<1x8x128xf32>
    %5 = vector.shape_cast %4 : vector<1x8x128xf32> to vector<8x128xf32>
    %6 = arith.truncf %1 : vector<8x128xf32> to vector<8x128xbf16>
    %cst_4 = arith.constant dense<0.000000e+00> : vector<8x128xf32>
    %7 = tpu.matmul %6, %0, %cst_4 {dimension_numbers = #tpu.dot_dimension_numbers<[1], [0], [0], [1], [0, 0, 1, 1], [], []>} : vector<8x128xbf16>, vector<128x128xbf16>, vector<8x128xf32> -> vector<8x128xf32>
    %8 = arith.addf %5, %7 : vector<8x128xf32>
    %9 = arith.negf %8 : vector<8x128xf32>
    %10 = math.exp %9 : vector<8x128xf32>
    %cst_5 = arith.constant 1.000000e+00 : f32
    %11 = vector.broadcast %cst_5 : f32 to vector<8x128xf32>
    %12 = arith.addf %11, %10 : vector<8x128xf32>
    %13 = arith.divf %11, %12 : vector<8x128xf32>
    %c96_i32 = arith.constant 96 : i32
    %14 = tpu.dynamic_rotate %13 by %c96_i32 dim 1 : vector<8x128xf32>, i32 -> vector<8x128xf32>
    %c64_i32 = arith.constant 64 : i32
    %15 = tpu.dynamic_rotate %13 by %c64_i32 dim 1 : vector<8x128xf32>, i32 -> vector<8x128xf32>
    %cst_6 = arith.constant 2.000000e+00 : f32
    %16 = vector.broadcast %cst_6 : f32 to vector<8x128xf32>
    %17 = arith.mulf %16, %15 : vector<8x128xf32>
    %cst_7 = arith.constant 1.000000e+00 : f32
    %18 = vector.broadcast %cst_7 : f32 to vector<8x128xf32>
    %19 = arith.subf %17, %18 : vector<8x128xf32>
    %c32_i32 = arith.constant 32 : i32
    %20 = tpu.dynamic_rotate %13 by %c32_i32 dim 1 : vector<8x128xf32>, i32 -> vector<8x128xf32>
    %21 = arith.mulf %14, %2 : vector<8x128xf32>
    %22 = arith.mulf %13, %19 : vector<8x128xf32>
    %23 = arith.addf %21, %22 : vector<8x128xf32>
    %24 = math.tanh %23 : vector<8x128xf32>
    %25 = arith.mulf %20, %24 : vector<8x128xf32>
    %c1_i32 = arith.constant 1 : i32
    %26 = arith.index_cast %c1_i32 : i32 to index
    %c0_8 = arith.constant 0 : index
    %c0_9 = arith.constant 0 : index
    %27 = vector.load %arg1[%26, %c0_8, %c0_9] : memref<8x8x128xf32, #tpu.memory_space<vmem>>, vector<1x8x128xf32>
    %28 = vector.shape_cast %27 : vector<1x8x128xf32> to vector<8x128xf32>
    %29 = arith.truncf %25 : vector<8x128xf32> to vector<8x128xbf16>
    %cst_10 = arith.constant dense<0.000000e+00> : vector<8x128xf32>
    %30 = tpu.matmul %29, %0, %cst_10 {dimension_numbers = #tpu.dot_dimension_numbers<[1], [0], [0], [1], [0, 0, 1, 1], [], []>} : vector<8x128xbf16>, vector<128x128xbf16>, vector<8x128xf32> -> vector<8x128xf32>
    %31 = arith.addf %28, %30 : vector<8x128xf32>
    %32 = arith.negf %31 : vector<8x128xf32>
    %33 = math.exp %32 : vector<8x128xf32>
    %cst_11 = arith.constant 1.000000e+00 : f32
    %34 = vector.broadcast %cst_11 : f32 to vector<8x128xf32>
    %35 = arith.addf %34, %33 : vector<8x128xf32>
    %36 = arith.divf %34, %35 : vector<8x128xf32>
    %c96_i32_12 = arith.constant 96 : i32
    %37 = tpu.dynamic_rotate %36 by %c96_i32_12 dim 1 : vector<8x128xf32>, i32 -> vector<8x128xf32>
    %c64_i32_13 = arith.constant 64 : i32
    %38 = tpu.dynamic_rotate %36 by %c64_i32_13 dim 1 : vector<8x128xf32>, i32 -> vector<8x128xf32>
    %cst_14 = arith.constant 2.000000e+00 : f32
    %39 = vector.broadcast %cst_14 : f32 to vector<8x128xf32>
    %40 = arith.mulf %39, %38 : vector<8x128xf32>
    %cst_15 = arith.constant 1.000000e+00 : f32
    %41 = vector.broadcast %cst_15 : f32 to vector<8x128xf32>
    %42 = arith.subf %40, %41 : vector<8x128xf32>
    %c32_i32_16 = arith.constant 32 : i32
    %43 = tpu.dynamic_rotate %36 by %c32_i32_16 dim 1 : vector<8x128xf32>, i32 -> vector<8x128xf32>
    %44 = arith.mulf %37, %23 : vector<8x128xf32>
    %45 = arith.mulf %36, %42 : vector<8x128xf32>
    %46 = arith.addf %44, %45 : vector<8x128xf32>
    %47 = math.tanh %46 : vector<8x128xf32>
    %48 = arith.mulf %43, %47 : vector<8x128xf32>
    %c2_i32 = arith.constant 2 : i32
    %49 = arith.index_cast %c2_i32 : i32 to index
    %c0_17 = arith.constant 0 : index
    %c0_18 = arith.constant 0 : index
    %50 = vector.load %arg1[%49, %c0_17, %c0_18] : memref<8x8x128xf32, #tpu.memory_space<vmem>>, vector<1x8x128xf32>
    %51 = vector.shape_cast %50 : vector<1x8x128xf32> to vector<8x128xf32>
    %52 = arith.truncf %48 : vector<8x128xf32> to vector<8x128xbf16>
    %cst_19 = arith.constant dense<0.000000e+00> : vector<8x128xf32>
    %53 = tpu.matmul %52, %0, %cst_19 {dimension_numbers = #tpu.dot_dimension_numbers<[1], [0], [0], [1], [0, 0, 1, 1], [], []>} : vector<8x128xbf16>, vector<128x128xbf16>, vector<8x128xf32> -> vector<8x128xf32>
    %54 = arith.addf %51, %53 : vector<8x128xf32>
    %55 = arith.negf %54 : vector<8x128xf32>
    %56 = math.exp %55 : vector<8x128xf32>
    %cst_20 = arith.constant 1.000000e+00 : f32
    %57 = vector.broadcast %cst_20 : f32 to vector<8x128xf32>
    %58 = arith.addf %57, %56 : vector<8x128xf32>
    %59 = arith.divf %57, %58 : vector<8x128xf32>
    %c96_i32_21 = arith.constant 96 : i32
    %60 = tpu.dynamic_rotate %59 by %c96_i32_21 dim 1 : vector<8x128xf32>, i32 -> vector<8x128xf32>
    %c64_i32_22 = arith.constant 64 : i32
    %61 = tpu.dynamic_rotate %59 by %c64_i32_22 dim 1 : vector<8x128xf32>, i32 -> vector<8x128xf32>
    %cst_23 = arith.constant 2.000000e+00 : f32
    %62 = vector.broadcast %cst_23 : f32 to vector<8x128xf32>
    %63 = arith.mulf %62, %61 : vector<8x128xf32>
    %cst_24 = arith.constant 1.000000e+00 : f32
    %64 = vector.broadcast %cst_24 : f32 to vector<8x128xf32>
    %65 = arith.subf %63, %64 : vector<8x128xf32>
    %c32_i32_25 = arith.constant 32 : i32
    %66 = tpu.dynamic_rotate %59 by %c32_i32_25 dim 1 : vector<8x128xf32>, i32 -> vector<8x128xf32>
    %67 = arith.mulf %60, %46 : vector<8x128xf32>
    %68 = arith.mulf %59, %65 : vector<8x128xf32>
    %69 = arith.addf %67, %68 : vector<8x128xf32>
    %70 = math.tanh %69 : vector<8x128xf32>
    %71 = arith.mulf %66, %70 : vector<8x128xf32>
    %c3_i32 = arith.constant 3 : i32
    %72 = arith.index_cast %c3_i32 : i32 to index
    %c0_26 = arith.constant 0 : index
    %c0_27 = arith.constant 0 : index
    %73 = vector.load %arg1[%72, %c0_26, %c0_27] : memref<8x8x128xf32, #tpu.memory_space<vmem>>, vector<1x8x128xf32>
    %74 = vector.shape_cast %73 : vector<1x8x128xf32> to vector<8x128xf32>
    %75 = arith.truncf %71 : vector<8x128xf32> to vector<8x128xbf16>
    %cst_28 = arith.constant dense<0.000000e+00> : vector<8x128xf32>
    %76 = tpu.matmul %75, %0, %cst_28 {dimension_numbers = #tpu.dot_dimension_numbers<[1], [0], [0], [1], [0, 0, 1, 1], [], []>} : vector<8x128xbf16>, vector<128x128xbf16>, vector<8x128xf32> -> vector<8x128xf32>
    %77 = arith.addf %74, %76 : vector<8x128xf32>
    %78 = arith.negf %77 : vector<8x128xf32>
    %79 = math.exp %78 : vector<8x128xf32>
    %cst_29 = arith.constant 1.000000e+00 : f32
    %80 = vector.broadcast %cst_29 : f32 to vector<8x128xf32>
    %81 = arith.addf %80, %79 : vector<8x128xf32>
    %82 = arith.divf %80, %81 : vector<8x128xf32>
    %c96_i32_30 = arith.constant 96 : i32
    %83 = tpu.dynamic_rotate %82 by %c96_i32_30 dim 1 : vector<8x128xf32>, i32 -> vector<8x128xf32>
    %c64_i32_31 = arith.constant 64 : i32
    %84 = tpu.dynamic_rotate %82 by %c64_i32_31 dim 1 : vector<8x128xf32>, i32 -> vector<8x128xf32>
    %cst_32 = arith.constant 2.000000e+00 : f32
    %85 = vector.broadcast %cst_32 : f32 to vector<8x128xf32>
    %86 = arith.mulf %85, %84 : vector<8x128xf32>
    %cst_33 = arith.constant 1.000000e+00 : f32
    %87 = vector.broadcast %cst_33 : f32 to vector<8x128xf32>
    %88 = arith.subf %86, %87 : vector<8x128xf32>
    %c32_i32_34 = arith.constant 32 : i32
    %89 = tpu.dynamic_rotate %82 by %c32_i32_34 dim 1 : vector<8x128xf32>, i32 -> vector<8x128xf32>
    %90 = arith.mulf %83, %69 : vector<8x128xf32>
    %91 = arith.mulf %82, %88 : vector<8x128xf32>
    %92 = arith.addf %90, %91 : vector<8x128xf32>
    %93 = math.tanh %92 : vector<8x128xf32>
    %94 = arith.mulf %89, %93 : vector<8x128xf32>
    %c4_i32 = arith.constant 4 : i32
    %95 = arith.index_cast %c4_i32 : i32 to index
    %c0_35 = arith.constant 0 : index
    %c0_36 = arith.constant 0 : index
    %96 = vector.load %arg1[%95, %c0_35, %c0_36] : memref<8x8x128xf32, #tpu.memory_space<vmem>>, vector<1x8x128xf32>
    %97 = vector.shape_cast %96 : vector<1x8x128xf32> to vector<8x128xf32>
    %98 = arith.truncf %94 : vector<8x128xf32> to vector<8x128xbf16>
    %cst_37 = arith.constant dense<0.000000e+00> : vector<8x128xf32>
    %99 = tpu.matmul %98, %0, %cst_37 {dimension_numbers = #tpu.dot_dimension_numbers<[1], [0], [0], [1], [0, 0, 1, 1], [], []>} : vector<8x128xbf16>, vector<128x128xbf16>, vector<8x128xf32> -> vector<8x128xf32>
    %100 = arith.addf %97, %99 : vector<8x128xf32>
    %101 = arith.negf %100 : vector<8x128xf32>
    %102 = math.exp %101 : vector<8x128xf32>
    %cst_38 = arith.constant 1.000000e+00 : f32
    %103 = vector.broadcast %cst_38 : f32 to vector<8x128xf32>
    %104 = arith.addf %103, %102 : vector<8x128xf32>
    %105 = arith.divf %103, %104 : vector<8x128xf32>
    %c96_i32_39 = arith.constant 96 : i32
    %106 = tpu.dynamic_rotate %105 by %c96_i32_39 dim 1 : vector<8x128xf32>, i32 -> vector<8x128xf32>
    %c64_i32_40 = arith.constant 64 : i32
    %107 = tpu.dynamic_rotate %105 by %c64_i32_40 dim 1 : vector<8x128xf32>, i32 -> vector<8x128xf32>
    %cst_41 = arith.constant 2.000000e+00 : f32
    %108 = vector.broadcast %cst_41 : f32 to vector<8x128xf32>
    %109 = arith.mulf %108, %107 : vector<8x128xf32>
    %cst_42 = arith.constant 1.000000e+00 : f32
    %110 = vector.broadcast %cst_42 : f32 to vector<8x128xf32>
    %111 = arith.subf %109, %110 : vector<8x128xf32>
    %c32_i32_43 = arith.constant 32 : i32
    %112 = tpu.dynamic_rotate %105 by %c32_i32_43 dim 1 : vector<8x128xf32>, i32 -> vector<8x128xf32>
    %113 = arith.mulf %106, %92 : vector<8x128xf32>
    %114 = arith.mulf %105, %111 : vector<8x128xf32>
    %115 = arith.addf %113, %114 : vector<8x128xf32>
    %116 = math.tanh %115 : vector<8x128xf32>
    %117 = arith.mulf %112, %116 : vector<8x128xf32>
    %c5_i32 = arith.constant 5 : i32
    %118 = arith.index_cast %c5_i32 : i32 to index
    %c0_44 = arith.constant 0 : index
    %c0_45 = arith.constant 0 : index
    %119 = vector.load %arg1[%118, %c0_44, %c0_45] : memref<8x8x128xf32, #tpu.memory_space<vmem>>, vector<1x8x128xf32>
    %120 = vector.shape_cast %119 : vector<1x8x128xf32> to vector<8x128xf32>
    %121 = arith.truncf %117 : vector<8x128xf32> to vector<8x128xbf16>
    %cst_46 = arith.constant dense<0.000000e+00> : vector<8x128xf32>
    %122 = tpu.matmul %121, %0, %cst_46 {dimension_numbers = #tpu.dot_dimension_numbers<[1], [0], [0], [1], [0, 0, 1, 1], [], []>} : vector<8x128xbf16>, vector<128x128xbf16>, vector<8x128xf32> -> vector<8x128xf32>
    %123 = arith.addf %120, %122 : vector<8x128xf32>
    %124 = arith.negf %123 : vector<8x128xf32>
    %125 = math.exp %124 : vector<8x128xf32>
    %cst_47 = arith.constant 1.000000e+00 : f32
    %126 = vector.broadcast %cst_47 : f32 to vector<8x128xf32>
    %127 = arith.addf %126, %125 : vector<8x128xf32>
    %128 = arith.divf %126, %127 : vector<8x128xf32>
    %c96_i32_48 = arith.constant 96 : i32
    %129 = tpu.dynamic_rotate %128 by %c96_i32_48 dim 1 : vector<8x128xf32>, i32 -> vector<8x128xf32>
    %c64_i32_49 = arith.constant 64 : i32
    %130 = tpu.dynamic_rotate %128 by %c64_i32_49 dim 1 : vector<8x128xf32>, i32 -> vector<8x128xf32>
    %cst_50 = arith.constant 2.000000e+00 : f32
    %131 = vector.broadcast %cst_50 : f32 to vector<8x128xf32>
    %132 = arith.mulf %131, %130 : vector<8x128xf32>
    %cst_51 = arith.constant 1.000000e+00 : f32
    %133 = vector.broadcast %cst_51 : f32 to vector<8x128xf32>
    %134 = arith.subf %132, %133 : vector<8x128xf32>
    %c32_i32_52 = arith.constant 32 : i32
    %135 = tpu.dynamic_rotate %128 by %c32_i32_52 dim 1 : vector<8x128xf32>, i32 -> vector<8x128xf32>
    %136 = arith.mulf %129, %115 : vector<8x128xf32>
    %137 = arith.mulf %128, %134 : vector<8x128xf32>
    %138 = arith.addf %136, %137 : vector<8x128xf32>
    %139 = math.tanh %138 : vector<8x128xf32>
    %140 = arith.mulf %135, %139 : vector<8x128xf32>
    %c6_i32 = arith.constant 6 : i32
    %141 = arith.index_cast %c6_i32 : i32 to index
    %c0_53 = arith.constant 0 : index
    %c0_54 = arith.constant 0 : index
    %142 = vector.load %arg1[%141, %c0_53, %c0_54] : memref<8x8x128xf32, #tpu.memory_space<vmem>>, vector<1x8x128xf32>
    %143 = vector.shape_cast %142 : vector<1x8x128xf32> to vector<8x128xf32>
    %144 = arith.truncf %140 : vector<8x128xf32> to vector<8x128xbf16>
    %cst_55 = arith.constant dense<0.000000e+00> : vector<8x128xf32>
    %145 = tpu.matmul %144, %0, %cst_55 {dimension_numbers = #tpu.dot_dimension_numbers<[1], [0], [0], [1], [0, 0, 1, 1], [], []>} : vector<8x128xbf16>, vector<128x128xbf16>, vector<8x128xf32> -> vector<8x128xf32>
    %146 = arith.addf %143, %145 : vector<8x128xf32>
    %147 = arith.negf %146 : vector<8x128xf32>
    %148 = math.exp %147 : vector<8x128xf32>
    %cst_56 = arith.constant 1.000000e+00 : f32
    %149 = vector.broadcast %cst_56 : f32 to vector<8x128xf32>
    %150 = arith.addf %149, %148 : vector<8x128xf32>
    %151 = arith.divf %149, %150 : vector<8x128xf32>
    %c96_i32_57 = arith.constant 96 : i32
    %152 = tpu.dynamic_rotate %151 by %c96_i32_57 dim 1 : vector<8x128xf32>, i32 -> vector<8x128xf32>
    %c64_i32_58 = arith.constant 64 : i32
    %153 = tpu.dynamic_rotate %151 by %c64_i32_58 dim 1 : vector<8x128xf32>, i32 -> vector<8x128xf32>
    %cst_59 = arith.constant 2.000000e+00 : f32
    %154 = vector.broadcast %cst_59 : f32 to vector<8x128xf32>
    %155 = arith.mulf %154, %153 : vector<8x128xf32>
    %cst_60 = arith.constant 1.000000e+00 : f32
    %156 = vector.broadcast %cst_60 : f32 to vector<8x128xf32>
    %157 = arith.subf %155, %156 : vector<8x128xf32>
    %c32_i32_61 = arith.constant 32 : i32
    %158 = tpu.dynamic_rotate %151 by %c32_i32_61 dim 1 : vector<8x128xf32>, i32 -> vector<8x128xf32>
    %159 = arith.mulf %152, %138 : vector<8x128xf32>
    %160 = arith.mulf %151, %157 : vector<8x128xf32>
    %161 = arith.addf %159, %160 : vector<8x128xf32>
    %162 = math.tanh %161 : vector<8x128xf32>
    %163 = arith.mulf %158, %162 : vector<8x128xf32>
    %c7_i32 = arith.constant 7 : i32
    %164 = arith.index_cast %c7_i32 : i32 to index
    %c0_62 = arith.constant 0 : index
    %c0_63 = arith.constant 0 : index
    %165 = vector.load %arg1[%164, %c0_62, %c0_63] : memref<8x8x128xf32, #tpu.memory_space<vmem>>, vector<1x8x128xf32>
    %166 = vector.shape_cast %165 : vector<1x8x128xf32> to vector<8x128xf32>
    %167 = arith.truncf %163 : vector<8x128xf32> to vector<8x128xbf16>
    %cst_64 = arith.constant dense<0.000000e+00> : vector<8x128xf32>
    %168 = tpu.matmul %167, %0, %cst_64 {dimension_numbers = #tpu.dot_dimension_numbers<[1], [0], [0], [1], [0, 0, 1, 1], [], []>} : vector<8x128xbf16>, vector<128x128xbf16>, vector<8x128xf32> -> vector<8x128xf32>
    %169 = arith.addf %166, %168 : vector<8x128xf32>
    %170 = arith.negf %169 : vector<8x128xf32>
    %171 = math.exp %170 : vector<8x128xf32>
    %cst_65 = arith.constant 1.000000e+00 : f32
    %172 = vector.broadcast %cst_65 : f32 to vector<8x128xf32>
    %173 = arith.addf %172, %171 : vector<8x128xf32>
    %174 = arith.divf %172, %173 : vector<8x128xf32>
    %c96_i32_66 = arith.constant 96 : i32
    %175 = tpu.dynamic_rotate %174 by %c96_i32_66 dim 1 : vector<8x128xf32>, i32 -> vector<8x128xf32>
    %c64_i32_67 = arith.constant 64 : i32
    %176 = tpu.dynamic_rotate %174 by %c64_i32_67 dim 1 : vector<8x128xf32>, i32 -> vector<8x128xf32>
    %cst_68 = arith.constant 2.000000e+00 : f32
    %177 = vector.broadcast %cst_68 : f32 to vector<8x128xf32>
    %178 = arith.mulf %177, %176 : vector<8x128xf32>
    %cst_69 = arith.constant 1.000000e+00 : f32
    %179 = vector.broadcast %cst_69 : f32 to vector<8x128xf32>
    %180 = arith.subf %178, %179 : vector<8x128xf32>
    %c32_i32_70 = arith.constant 32 : i32
    %181 = tpu.dynamic_rotate %174 by %c32_i32_70 dim 1 : vector<8x128xf32>, i32 -> vector<8x128xf32>
    %182 = arith.mulf %175, %161 : vector<8x128xf32>
    %183 = arith.mulf %174, %180 : vector<8x128xf32>
    %184 = arith.addf %182, %183 : vector<8x128xf32>
    %185 = math.tanh %184 : vector<8x128xf32>
    %186 = arith.mulf %181, %185 : vector<8x128xf32>
    %c8_i32 = arith.constant 8 : i32
    %c0_71 = arith.constant 0 : index
    %c0_72 = arith.constant 0 : index
    %187 = vector.load %arg3[%c0_71, %c0_72] : memref<1x128xf32, #tpu.memory_space<vmem>>, vector<1x128xf32>
    %cst_73 = arith.constant dense<0.000000e+00> : vector<1x8xf32>
    %188 = tpu.matmul %187, %186, %cst_73 {dimension_numbers = #tpu.dot_dimension_numbers<[1], [1], [0], [0], [0, 0, 1, 0], [], []>} : vector<1x128xf32>, vector<8x128xf32>, vector<1x8xf32> -> vector<1x8xf32>
    %c0_74 = arith.constant 0 : index
    %c0_75 = arith.constant 0 : index
    %189 = vector.load %arg4[%c0_74, %c0_75] : memref<1x8xf32, #tpu.memory_space<vmem>>, vector<1x8xf32>
    tpu.vector_store %arg4[%c0_74, %c0_75], %188 {strides = array<i32>} : memref<1x8xf32, #tpu.memory_space<vmem>>, vector<1x8xf32>,
    return
  }
  func.func @transform_0(%arg0: i32) -> (i32, i32, i32) {
    %c0_i32 = arith.constant 0 : i32
    %c0_i32_0 = arith.constant 0 : i32
    %c0_i32_1 = arith.constant 0 : i32
    return %c0_i32, %arg0, %c0_i32_0 : i32, i32, i32
  }
  func.func @transform_1(%arg0: i32) -> (i32, i32) {
    %c0_i32 = arith.constant 0 : i32
    %c0_i32_0 = arith.constant 0 : i32
    %c0_i32_1 = arith.constant 0 : i32
    return %c0_i32, %c0_i32_0 : i32, i32
  }
  func.func @transform_2(%arg0: i32) -> (i32, i32) {
    %c0_i32 = arith.constant 0 : i32
    %c0_i32_0 = arith.constant 0 : i32
    %c0_i32_1 = arith.constant 0 : i32
    return %c0_i32, %c0_i32_0 : i32, i32
  }
  func.func @transform_3(%arg0: i32) -> (i32, i32) {
    %c0_i32 = arith.constant 0 : i32
    %c0_i32_0 = arith.constant 0 : i32
    return %c0_i32, %arg0 : i32, i32
  }
}

</mosaic_0001>

<bundles_post_ra>
// kernel: tpu_custom_call.1
= control target key start
LH: loop header
LB: loop body
LE: loop exit
PB: predicated region body
PF: predicated region fallthrough
CT: control target
= control target key end

     0   :  { %8 = vsyncpa [#allocation3], 0  ;;  %s1362_s0 = inlined_call_operand.hbm [shape: f32[8,8,128], index: 0, kind: input, shape index: {}]   ;;  %s1363_s1 = inlined_call_operand.hbm [shape: bf16[128,128], index: 1, kind: input, shape index: {}]   ;;  %s1364_s2 = inlined_call_operand.vmem [shape: f32[1,128], index: 2, kind: input, shape index: {}]   ;;  %s1365_s3 = inlined_call_operand.hbm [shape: f32[1,8], index: 3, kind: output, shape index: {}]  }
   0x1   :  { %9 = vsyncpa [#allocation6], 0 }
   0x2   :  { %10 = vsyncpa [#allocation4], 0  ;;  %s1102_s12 = smov [#allocation2]   ;;  %s1030_s16 = scalar_lea.hbm %s1362_s0, 1024 }
   0x3   :  { %s16_s13 = sshll.u32 %s1102_s12, 4  ;;  %p1031_p0 = scmp.ne.s32.totalorder %s1362_s0, %s1030_s16  ;;  %s17_s13 = int_to_ptr.vmem [resolvable:$true] %s16_s13 }
   0x4   :  { %p1034_p1 = scmp.lt.u32.totalorder %s1030_s16, %s1362_s0 }
   0x6   :  { %p1036_p2 = pnand %p1034_p1, %p1031_p0 }
   0x8   :  { %1039 = shalt.err (!%p1036_p2)
}
   0x9   :  { %s1040_s21 = scalar_lea.vmem %s17_s13, 1024  ;;  %p1045_p4 = scmp.lt.s32.totalorder %s17_s13, %s17_s13 }
   0xa   :  { %p1041_p3 = scmp.ne.s32.totalorder %s17_s13, %s1040_s21  ;;  %p1046_p5 = scmp.lt.s32.totalorder %s1040_s21, %s1040_s21 }
   0xc   :  { %p1047_p6 = por %p1046_p5, %p1045_p4 }
   0xe   :  { %p1048_p7 = pnand %p1047_p6, %p1041_p3 }
  0x10   :  { %1051 = shalt.err (!%p1048_p7)
}
  0x11   :  { %s1103_s22 = smov 128   ;;  %s1104_s23 = smov 8  }
  0x12   :  { %22 = dma.hbm_to_vmem [thread:$0]  %s1362_s0, 1024, %s17_s13, [#allocation3], %s1103_s22, %s1103_s22, %s1104_s23  }
  0x13   :  { %s1105_s26 = smov [#allocation5]   ;;  %s1052_s30 = scalar_lea.hbm %s1363_s1, 1024 }
  0x14   :  { %s28_s27 = sshll.u32 %s1105_s26, 4  ;;  %p1053_p8 = scmp.ne.s32.totalorder %s1363_s1, %s1052_s30  ;;  %s29_s27 = int_to_ptr.vmem [resolvable:$true] %s28_s27 }
  0x15   :  { %p1056_p9 = scmp.lt.u32.totalorder %s1052_s30, %s1363_s1 }
  0x17   :  { %p1058_p10 = pnand %p1056_p9, %p1053_p8 }
  0x19   :  { %1061 = shalt.err (!%p1058_p10)
}
  0x1a   :  { %s1062_s8 = scalar_lea.vmem %s29_s27, 1024  ;;  %p1067_p12 = scmp.lt.s32.totalorder %s29_s27, %s29_s27 }
  0x1b   :  { %p1063_p11 = scmp.ne.s32.totalorder %s29_s27, %s1062_s8  ;;  %p1068_p13 = scmp.lt.s32.totalorder %s1062_s8, %s1062_s8 }
  0x1d   :  { %p1069_p0 = por %p1068_p13, %p1067_p12 }
  0x1f   :  { %p1070_p1 = pnand %p1069_p0, %p1063_p11 }
  0x21   :  { %1073 = shalt.err (!%p1070_p1)
}
  0x22   :  { %s1106_s0 = smov 64   ;;  %s1107_s9 = smov 4  }
  0x23   :  { %34 = dma.hbm_to_vmem [thread:$0]  %s1363_s1, 1024, %s29_s27, [#allocation6], %s1106_s0, %s1106_s0, %s1107_s9  }
  0x24   :  { %1096 = dma.done.wait [#allocation3], 1024  }
  0x25   :  { %1097 = vsyncadd [#allocation3], 4294966272 }
  0x26   :  { %1098 = dma.done.wait [#allocation6], 1024  }
  0x27   :  { %1099 = vsyncadd [#allocation6], 4294966272  ;;  %v1108_v0 = vmov 0.0   ;;  %vm1109_vm0 = vmmov 0   ;;  %v1166_v1 = vld [vmem:[#allocation5] sm:$0xff]   ;;  %v1169_v2 = vld [vmem:[#allocation5 + $0x8] sm:$0xff]  }
  0x28   :  { %797 = vmatprep.subr.bf16.mxu0 %v1108_v0  ;;  %813 = vmatprep.mubr.msk.bf16.mxu0 %vm1109_vm0, %v1108_v0  ;;  %v1175_v3 = vld [vmem:[#allocation5 + $0x10] sm:$0xff]   ;;  %v1181_v4 = vld [vmem:[#allocation5 + $0x18] sm:$0xff]   ;;  %v1187_v5 = vld [vmem:[#allocation5 + $0x20] sm:$0xff]   ;;  %v1110_v9 = vmov 0   ;;  %s1111_s1 = smov 32   ;;  %s1112_s12 = smov 96  }
  0x29   :  { %817 = vmatprep.subr.bf16.mxu1 %v1108_v0  ;;  %833 = vmatprep.mubr.msk.bf16.mxu1 %vm1109_vm0, %v1108_v0  ;;  %v1193_v6 = vld [vmem:[#allocation5 + $0x28] sm:$0xff]   ;;  %v1199_v7 = vld [vmem:[#allocation5 + $0x30] sm:$0xff]   ;;  %v1205_v8 = vld [vmem:[#allocation5 + $0x38] sm:$0xff]   ;;  %s1113_s15 = smov [#allocation7]   ;;  %vm681_vm1 = vcmask 57344  }
  0x2a   :  { %798 = vmatpush3.bf16.msra.mxu0 %v1166_v1  ;;  %818 = vmatpush3.bf16.msra.mxu1 %v1166_v1  ;;  %v60_v10 = vld [vmem:[#allocation2] sm:$0xff]  ;;  %v170_v31 = vld [vmem:[#allocation2 + $0x8] sm:$0xff]  ;;  %v233_v52 = vld [vmem:[#allocation2 + $0x10] sm:$0xff]  ;;  %s689_s16 = sshll.u32 %s1113_s15, 4  ;;  %s690_s16 = int_to_ptr.vmem [resolvable:$true] %s689_s16 }
  0x2b   :  { %799 = vmatprep.subr.bf16.mxu0 %v1108_v0  ;;  %819 = vmatprep.subr.bf16.mxu1 %v1108_v0  ;;  %s1074_s17 = scalar_lea.vmem %s690_s16, 16  ;;  %s1078_s18 = scalar_lea.vmem %s690_s16, 32 }
  0x2c   :  { %p1075_p2 = scmp.ne.s32.totalorder %s690_s16, %s1074_s17  ;;  %p1079_p3 = scmp.lt.s32.totalorder %s690_s16, %s690_s16 }
  0x2d   :  { %p1080_p4 = scmp.lt.s32.totalorder %s1078_s18, %s1074_s17 }
  0x2e   :  { %800 = vmatpush3.bf16.msra.mxu0 %v1169_v2  ;;  %820 = vmatpush3.bf16.msra.mxu1 %v1169_v2 }
  0x2f   :  { %801 = vmatprep.subr.bf16.mxu0 %v1108_v0  ;;  %821 = vmatprep.subr.bf16.mxu1 %v1108_v0  ;;  %p1081_p5 = por %p1080_p4, %p1079_p3 }
  0x31   :  { %p1082_p6 = pnand %p1081_p5, %p1075_p2 }
  0x32   :  { %802 = vmatpush3.bf16.msra.mxu0 %v1175_v3  ;;  %822 = vmatpush3.bf16.msra.mxu1 %v1175_v3 }
  0x33   :  { %803 = vmatprep.subr.bf16.mxu0 %v1108_v0  ;;  %823 = vmatprep.subr.bf16.mxu1 %v1108_v0 }
  0x36   :  { %804 = vmatpush3.bf16.msra.mxu0 %v1181_v4  ;;  %824 = vmatpush3.bf16.msra.mxu1 %v1181_v4 }
  0x37   :  { %805 = vmatprep.subr.bf16.mxu0 %v1108_v0  ;;  %825 = vmatprep.subr.bf16.mxu1 %v1108_v0 }
  0x3a   :  { %806 = vmatpush3.bf16.msra.mxu0 %v1187_v5  ;;  %826 = vmatpush3.bf16.msra.mxu1 %v1187_v5 }
  0x3b   :  { %807 = vmatprep.subr.bf16.mxu0 %v1108_v0  ;;  %827 = vmatprep.subr.bf16.mxu1 %v1108_v0 }
  0x3e   :  { %808 = vmatpush3.bf16.msra.mxu0 %v1193_v6  ;;  %828 = vmatpush3.bf16.msra.mxu1 %v1193_v6 }
  0x3f   :  { %809 = vmatprep.subr.bf16.mxu0 %v1108_v0  ;;  %829 = vmatprep.subr.bf16.mxu1 %v1108_v0 }
  0x42   :  { %810 = vmatpush3.bf16.msra.mxu0 %v1199_v7  ;;  %830 = vmatpush3.bf16.msra.mxu1 %v1199_v7 }
  0x43   :  { %811 = vmatprep.subr.bf16.mxu0 %v1108_v0  ;;  %831 = vmatprep.subr.bf16.mxu1 %v1108_v0 }
  0x46   :  { %812 = vmatpush3.bf16.msra.mxu0 %v1205_v8  ;;  %832 = vmatpush3.bf16.msra.mxu1 %v1205_v8 }
  0x47   :  { %837 = vmatprep.subr.bf16.mxu0 %v1108_v0  ;;  %857 = vmatprep.subr.bf16.mxu1 %v1108_v0 }
  0x49   :  { %814 = vmatmul.mubr.bf16.vlgmr.msra.gmra.mrb[0].mxu0 %v1110_v9 }
  0x4a   :  { %838 = vmatpush3.bf16.msra.mxu0 %v1166_v1  ;;  %853 = vmatprep.mubr.msk.bf16.mxu0 %vm1109_vm0, %v1108_v0 }
  0x4b   :  { %839 = vmatprep.subr.bf16.mxu0 %v1108_v0 }
  0x4e   :  { %840 = vmatpush3.bf16.msra.mxu0 %v1169_v2 }
  0x4f   :  { %841 = vmatprep.subr.bf16.mxu0 %v1108_v0 }
  0x52   :  { %842 = vmatpush3.bf16.msra.mxu0 %v1175_v3 }
  0x53   :  { %843 = vmatprep.subr.bf16.mxu0 %v1108_v0 }
  0x56   :  { %844 = vmatpush3.bf16.msra.mxu0 %v1181_v4 }
  0x57   :  { %845 = vmatprep.subr.bf16.mxu0 %v1108_v0 }
  0x5a   :  { %846 = vmatpush3.bf16.msra.mxu0 %v1187_v5 }
  0x5b   :  { %847 = vmatprep.subr.bf16.mxu0 %v1108_v0 }
  0x5e   :  { %848 = vmatpush3.bf16.msra.mxu0 %v1193_v6 }
  0x5f   :  { %849 = vmatprep.subr.bf16.mxu0 %v1108_v0 }
  0x62   :  { %850 = vmatpush3.bf16.msra.mxu0 %v1199_v7 }
  0x63   :  { %851 = vmatprep.subr.bf16.mxu0 %v1108_v0 }
  0x66   :  { %852 = vmatpush3.bf16.msra.mxu0 %v1205_v8 }
  0x67   :  { %877 = vmatprep.subr.bf16.mxu0 %v1108_v0 }
 0x11c   :  { %v143_v11 = vpop.f32.mrb[0].mxu0 }
 0x11d   :  { %v149_v12 = vadd.f32 %v143_v11, %v60_v10  ;;  %v815_v13 = vpop.f32.mrb[1].mxu0 }
 0x11e   :  { %v146_v14 = vpop.f32.mrb[2].mxu0 }
 0x11f   :  { %v707_v15 = vmul.f32 -1.442695, %v149_v12  ;;  %v816_v16 = vpop.f32.mrb[3].mxu0 }
 0x121   :  { %982 = vpow2.f32 %v707_v15 }
 0x12b   :  { %v983_v17 = vpop.eup %982 }
 0x12c   :  { %v153_v18 = vadd.f32 1.0, %v983_v17 }
 0x12e   :  { %984 = vrcp.f32 %v153_v18  ;;  %v296_v18 = vld [vmem:[#allocation2 + $0x18] sm:$0xff] }
 0x138   :  { %v985_v19 = vpop.eup %984 }
 0x139   :  { %162 = vrot.lane.b32.xlu1 %v985_v19, %s1111_s1  ;;  %158 = vrot.lane.b32.xlu0 %v985_v19, %s1106_s0 }
 0x13d   :  { %156 = vrot.lane.b32.xlu0 %v985_v19, %s1112_s12 }
 0x1ab   :  { %v159_v20 = vpop.permute.xlu0 %158  ;;  %v163_v28 = vpop.permute.xlu1 %162 }
 0x1ac   :  { %v160_v21 = vmul.f32 2.0, %v159_v20 }
 0x1ae   :  { %v708_v22 = vadd.f32 -1.0, %v160_v21 }
 0x1af   :  { %v157_v23 = vpop.permute.xlu0 %156 }
 0x1b0   :  { %v165_v24 = vmul.f32 %v985_v19, %v708_v22  ;;  %v164_v25 = vmul.f32 0.0, %v157_v23 }
 0x1b2   :  { %v166_v26 = vadd.f32 %v165_v24, %v164_v25 }
 0x1b4   :  { %986 = vtanh.f32 %v166_v26 }
 0x1be   :  { %v987_v27 = vpop.eup %986 }
 0x1bf   :  { %v168_v29 = vmul.f32 %v987_v27, %v163_v28 }
 0x1c1   :  { %v171_v30 = vpack.c.bf16 %v168_v29, %v168_v29 }
 0x1c3   :  { %834 = vmatmul.mubr.bf16.vlgmr.msra.gmra.mrb[0].mxu1 %v171_v30 }
 0x1c4   :  { %858 = vmatpush3.bf16.msra.mxu1 %v1166_v1  ;;  %873 = vmatprep.mubr.msk.bf16.mxu1 %vm1109_vm0, %v1108_v0 }
 0x1c5   :  { %859 = vmatprep.subr.bf16.mxu1 %v1108_v0 }
 0x1c8   :  { %860 = vmatpush3.bf16.msra.mxu1 %v1169_v2 }
 0x1c9   :  { %861 = vmatprep.subr.bf16.mxu1 %v1108_v0 }
 0x1cc   :  { %862 = vmatpush3.bf16.msra.mxu1 %v1175_v3 }
 0x1cd   :  { %863 = vmatprep.subr.bf16.mxu1 %v1108_v0 }
 0x1d0   :  { %864 = vmatpush3.bf16.msra.mxu1 %v1181_v4 }
 0x1d1   :  { %865 = vmatprep.subr.bf16.mxu1 %v1108_v0 }
 0x1d4   :  { %866 = vmatpush3.bf16.msra.mxu1 %v1187_v5 }
 0x1d5   :  { %867 = vmatprep.subr.bf16.mxu1 %v1108_v0 }
 0x1d8   :  { %868 = vmatpush3.bf16.msra.mxu1 %v1193_v6 }
 0x1d9   :  { %869 = vmatprep.subr.bf16.mxu1 %v1108_v0 }
 0x1dc   :  { %870 = vmatpush3.bf16.msra.mxu1 %v1199_v7 }
 0x1dd   :  { %871 = vmatprep.subr.bf16.mxu1 %v1108_v0 }
 0x1e0   :  { %872 = vmatpush3.bf16.msra.mxu1 %v1205_v8 }
 0x1e1   :  { %897 = vmatprep.subr.bf16.mxu1 %v1108_v0 }
 0x296   :  { %v206_v32 = vpop.f32.mrb[0].mxu1 }
 0x297   :  { %v212_v33 = vadd.f32 %v206_v32, %v170_v31  ;;  %v835_v34 = vpop.f32.mrb[1].mxu1 }
 0x298   :  { %v209_v35 = vpop.f32.mrb[2].mxu1 }
 0x299   :  { %v709_v36 = vmul.f32 -1.442695, %v212_v33  ;;  %v836_v37 = vpop.f32.mrb[3].mxu1 }
 0x29b   :  { %988 = vpow2.f32 %v709_v36 }
 0x2a5   :  { %v989_v38 = vpop.eup %988 }
 0x2a6   :  { %v216_v39 = vadd.f32 1.0, %v989_v38 }
 0x2a8   :  { %990 = vrcp.f32 %v216_v39  ;;  %v359_v39 = vld [vmem:[#allocation2 + $0x20] sm:$0xff] }
 0x2b2   :  { %v991_v40 = vpop.eup %990 }
 0x2b3   :  { %219 = vrot.lane.b32.xlu0 %v991_v40, %s1112_s12  ;;  %221 = vrot.lane.b32.xlu1 %v991_v40, %s1106_s0 }
 0x2b7   :  { %225 = vrot.lane.b32.xlu1 %v991_v40, %s1111_s1 }
 0x325   :  { %v222_v41 = vpop.permute.xlu1 %221  ;;  %v220_v43 = vpop.permute.xlu0 %219 }
 0x326   :  { %v223_v42 = vmul.f32 2.0, %v222_v41  ;;  %v227_v45 = vmul.f32 %v220_v43, %v166_v26 }
 0x328   :  { %v710_v44 = vadd.f32 -1.0, %v223_v42 }
 0x329   :  { %v226_v49 = vpop.permute.xlu1 %225 }
 0x32a   :  { %v228_v46 = vmul.f32 %v991_v40, %v710_v44 }
 0x32c   :  { %v229_v47 = vadd.f32 %v228_v46, %v227_v45 }
 0x32e   :  { %992 = vtanh.f32 %v229_v47 }
 0x338   :  { %v993_v48 = vpop.eup %992 }
 0x339   :  { %v231_v50 = vmul.f32 %v993_v48, %v226_v49 }
 0x33b   :  { %v234_v51 = vpack.c.bf16 %v231_v50, %v231_v50 }
 0x33d   :  { %854 = vmatmul.mubr.bf16.vlgmr.msra.gmra.mrb[4].mxu0 %v234_v51 }
 0x33e   :  { %878 = vmatpush3.bf16.msra.mxu0 %v1166_v1  ;;  %893 = vmatprep.mubr.msk.bf16.mxu0 %vm1109_vm0, %v1108_v0 }
 0x33f   :  { %879 = vmatprep.subr.bf16.mxu0 %v1108_v0 }
 0x342   :  { %880 = vmatpush3.bf16.msra.mxu0 %v1169_v2 }
 0x343   :  { %881 = vmatprep.subr.bf16.mxu0 %v1108_v0 }
 0x346   :  { %882 = vmatpush3.bf16.msra.mxu0 %v1175_v3 }
 0x347   :  { %883 = vmatprep.subr.bf16.mxu0 %v1108_v0 }
 0x34a   :  { %884 = vmatpush3.bf16.msra.mxu0 %v1181_v4 }
 0x34b   :  { %885 = vmatprep.subr.bf16.mxu0 %v1108_v0 }
 0x34e   :  { %886 = vmatpush3.bf16.msra.mxu0 %v1187_v5 }
 0x34f   :  { %887 = vmatprep.subr.bf16.mxu0 %v1108_v0 }
 0x352   :  { %888 = vmatpush3.bf16.msra.mxu0 %v1193_v6 }
 0x353   :  { %889 = vmatprep.subr.bf16.mxu0 %v1108_v0 }
 0x356   :  { %890 = vmatpush3.bf16.msra.mxu0 %v1199_v7 }
 0x357   :  { %891 = vmatprep.subr.bf16.mxu0 %v1108_v0 }
 0x35a   :  { %892 = vmatpush3.bf16.msra.mxu0 %v1205_v8 }
 0x35b   :  { %917 = vmatprep.subr.bf16.mxu0 %v1108_v0 }
 0x410   :  { %v269_v53 = vpop.f32.mrb[4].mxu0 }
 0x411   :  { %v275_v54 = vadd.f32 %v269_v53, %v233_v52  ;;  %v855_v55 = vpop.f32.mrb[5].mxu0 }
 0x412   :  { %v272_v56 = vpop.f32.mrb[6].mxu0 }
 0x413   :  { %v711_v57 = vmul.f32 -1.442695, %v275_v54  ;;  %v856_v58 = vpop.f32.mrb[7].mxu0 }
 0x415   :  { %994 = vpow2.f32 %v711_v57 }
 0x41f   :  { %v995_v59 = vpop.eup %994 }
 0x420   :  { %v279_v60 = vadd.f32 1.0, %v995_v59 }
 0x422   :  { %996 = vrcp.f32 %v279_v60 }
 0x42c   :  { %v997_v61 = vpop.eup %996 }
 0x42d   :  { %282 = vrot.lane.b32.xlu1 %v997_v61, %s1112_s12  ;;  %284 = vrot.lane.b32.xlu0 %v997_v61, %s1106_s0 }
 0x431   :  { %288 = vrot.lane.b32.xlu0 %v997_v61, %s1111_s1 }
 0x49f   :  { %v285_v62 = vpop.permute.xlu0 %284  ;;  %v283_v9 = vpop.permute.xlu1 %282 }
 0x4a0   :  { %v286_v63 = vmul.f32 2.0, %v285_v62  ;;  %v290_v11 = vmul.f32 %v283_v9, %v229_v47 }
 0x4a2   :  { %v712_v10 = vadd.f32 -1.0, %v286_v63 }
 0x4a3   :  { %v289_v15 = vpop.permute.xlu0 %288 }
 0x4a4   :  { %v291_v12 = vmul.f32 %v997_v61, %v712_v10 }
 0x4a6   :  { %v292_v13 = vadd.f32 %v291_v12, %v290_v11 }
 0x4a8   :  { %998 = vtanh.f32 %v292_v13 }
 0x4b2   :  { %v999_v14 = vpop.eup %998 }
 0x4b3   :  { %v294_v16 = vmul.f32 %v999_v14, %v289_v15 }
 0x4b5   :  { %v297_v17 = vpack.c.bf16 %v294_v16, %v294_v16 }
 0x4b7   :  { %874 = vmatmul.mubr.bf16.vlgmr.msra.gmra.mrb[4].mxu1 %v297_v17 }
 0x4b8   :  { %898 = vmatpush3.bf16.msra.mxu1 %v1166_v1  ;;  %913 = vmatprep.mubr.msk.bf16.mxu1 %vm1109_vm0, %v1108_v0 }
 0x4b9   :  { %899 = vmatprep.subr.bf16.mxu1 %v1108_v0 }
 0x4bc   :  { %900 = vmatpush3.bf16.msra.mxu1 %v1169_v2 }
 0x4bd   :  { %901 = vmatprep.subr.bf16.mxu1 %v1108_v0 }
 0x4c0   :  { %902 = vmatpush3.bf16.msra.mxu1 %v1175_v3 }
 0x4c1   :  { %903 = vmatprep.subr.bf16.mxu1 %v1108_v0 }
 0x4c4   :  { %904 = vmatpush3.bf16.msra.mxu1 %v1181_v4 }
 0x4c5   :  { %905 = vmatprep.subr.bf16.mxu1 %v1108_v0 }
 0x4c8   :  { %906 = vmatpush3.bf16.msra.mxu1 %v1187_v5 }
 0x4c9   :  { %907 = vmatprep.subr.bf16.mxu1 %v1108_v0 }
 0x4cc   :  { %908 = vmatpush3.bf16.msra.mxu1 %v1193_v6 }
 0x4cd   :  { %909 = vmatprep.subr.bf16.mxu1 %v1108_v0 }
 0x4d0   :  { %910 = vmatpush3.bf16.msra.mxu1 %v1199_v7 }
 0x4d1   :  { %911 = vmatprep.subr.bf16.mxu1 %v1108_v0 }
 0x4d4   :  { %912 = vmatpush3.bf16.msra.mxu1 %v1205_v8 }
 0x4d5   :  { %937 = vmatprep.subr.bf16.mxu1 %v1108_v0 }
 0x58a   :  { %v332_v19 = vpop.f32.mrb[4].mxu1 }
 0x58b   :  { %v338_v20 = vadd.f32 %v332_v19, %v296_v18  ;;  %v875_v21 = vpop.f32.mrb[5].mxu1  ;;  %v485_v18 = vld [vmem:[#allocation2 + $0x30] sm:$0xff] }
 0x58c   :  { %v335_v22 = vpop.f32.mrb[6].mxu1 }
 0x58d   :  { %v713_v23 = vmul.f32 -1.442695, %v338_v20  ;;  %v876_v24 = vpop.f32.mrb[7].mxu1 }
 0x58f   :  { %1000 = vpow2.f32 %v713_v23 }
 0x599   :  { %v1001_v25 = vpop.eup %1000 }
 0x59a   :  { %v342_v26 = vadd.f32 1.0, %v1001_v25 }
 0x59c   :  { %1002 = vrcp.f32 %v342_v26 }
 0x5a6   :  { %v1003_v27 = vpop.eup %1002 }
 0x5a7   :  { %345 = vrot.lane.b32.xlu0 %v1003_v27, %s1112_s12  ;;  %347 = vrot.lane.b32.xlu1 %v1003_v27, %s1106_s0 }
 0x5ab   :  { %351 = vrot.lane.b32.xlu1 %v1003_v27, %s1111_s1 }
 0x619   :  { %v348_v28 = vpop.permute.xlu1 %347  ;;  %v346_v30 = vpop.permute.xlu0 %345 }
 0x61a   :  { %v349_v29 = vmul.f32 2.0, %v348_v28  ;;  %v353_v32 = vmul.f32 %v346_v30, %v292_v13 }
 0x61c   :  { %v714_v31 = vadd.f32 -1.0, %v349_v29 }
 0x61d   :  { %v352_v36 = vpop.permute.xlu1 %351 }
 0x61e   :  { %v354_v33 = vmul.f32 %v1003_v27, %v714_v31 }
 0x620   :  { %v355_v34 = vadd.f32 %v354_v33, %v353_v32 }
 0x622   :  { %1004 = vtanh.f32 %v355_v34 }
 0x62c   :  { %v1005_v35 = vpop.eup %1004 }
 0x62d   :  { %v357_v37 = vmul.f32 %v1005_v35, %v352_v36 }
 0x62f   :  { %v360_v38 = vpack.c.bf16 %v357_v37, %v357_v37 }
 0x631   :  { %894 = vmatmul.mubr.bf16.vlgmr.msra.gmra.mrb[8].mxu0 %v360_v38  ;;  %v548_v38 = vld [vmem:[#allocation2 + $0x38] sm:$0xff] }
 0x632   :  { %918 = vmatpush3.bf16.msra.mxu0 %v1166_v1  ;;  %933 = vmatprep.mubr.msk.bf16.mxu0 %vm1109_vm0, %v1108_v0 }
 0x633   :  { %919 = vmatprep.subr.bf16.mxu0 %v1108_v0 }
 0x636   :  { %920 = vmatpush3.bf16.msra.mxu0 %v1169_v2 }
 0x637   :  { %921 = vmatprep.subr.bf16.mxu0 %v1108_v0 }
 0x63a   :  { %922 = vmatpush3.bf16.msra.mxu0 %v1175_v3 }
 0x63b   :  { %923 = vmatprep.subr.bf16.mxu0 %v1108_v0 }
 0x63e   :  { %924 = vmatpush3.bf16.msra.mxu0 %v1181_v4 }
 0x63f   :  { %925 = vmatprep.subr.bf16.mxu0 %v1108_v0 }
 0x642   :  { %926 = vmatpush3.bf16.msra.mxu0 %v1187_v5 }
 0x643   :  { %927 = vmatprep.subr.bf16.mxu0 %v1108_v0 }
 0x646   :  { %928 = vmatpush3.bf16.msra.mxu0 %v1193_v6 }
 0x647   :  { %929 = vmatprep.subr.bf16.mxu0 %v1108_v0 }
 0x64a   :  { %930 = vmatpush3.bf16.msra.mxu0 %v1199_v7 }
 0x64b   :  { %931 = vmatprep.subr.bf16.mxu0 %v1108_v0 }
 0x64e   :  { %932 = vmatpush3.bf16.msra.mxu0 %v1205_v8 }
 0x64f   :  { %957 = vmatprep.subr.mxu0 %v1108_v0 }
 0x704   :  { %v395_v40 = vpop.f32.mrb[8].mxu0 }
 0x705   :  { %v401_v41 = vadd.f32 %v395_v40, %v359_v39  ;;  %v895_v42 = vpop.f32.mrb[9].mxu0 }
 0x706   :  { %v398_v43 = vpop.f32.mrb[10].mxu0 }
 0x707   :  { %v715_v44 = vmul.f32 -1.442695, %v401_v41  ;;  %v896_v45 = vpop.f32.mrb[11].mxu0 }
 0x709   :  { %1006 = vpow2.f32 %v715_v44 }
 0x713   :  { %v1007_v46 = vpop.eup %1006 }
 0x714   :  { %v405_v47 = vadd.f32 1.0, %v1007_v46 }
 0x716   :  { %1008 = vrcp.f32 %v405_v47 }
 0x720   :  { %v1009_v48 = vpop.eup %1008 }
 0x721   :  { %408 = vrot.lane.b32.xlu1 %v1009_v48, %s1112_s12  ;;  %410 = vrot.lane.b32.xlu0 %v1009_v48, %s1106_s0 }
 0x725   :  { %414 = vrot.lane.b32.xlu0 %v1009_v48, %s1111_s1 }
 0x793   :  { %v411_v49 = vpop.permute.xlu0 %410  ;;  %v409_v51 = vpop.permute.xlu1 %408 }
 0x794   :  { %v412_v50 = vmul.f32 2.0, %v411_v49  ;;  %v416_v53 = vmul.f32 %v409_v51, %v355_v34 }
 0x796   :  { %v716_v52 = vadd.f32 -1.0, %v412_v50 }
 0x797   :  { %v415_v57 = vpop.permute.xlu0 %414 }
 0x798   :  { %v417_v54 = vmul.f32 %v1009_v48, %v716_v52 }
 0x79a   :  { %v418_v55 = vadd.f32 %v417_v54, %v416_v53 }
 0x79c   :  { %1010 = vtanh.f32 %v418_v55 }
 0x7a6   :  { %v1011_v56 = vpop.eup %1010 }
 0x7a7   :  { %v420_v58 = vmul.f32 %v1011_v56, %v415_v57 }
 0x7a9   :  { %v423_v59 = vpack.c.bf16 %v420_v58, %v420_v58  ;;  %v610_v58 = vld [vmem:[%s1364_s2] sm:$0x1] }
 0x7ab   :  { %914 = vmatmul.mubr.bf16.vlgmr.msra.gmra.mrb[8].mxu1 %v423_v59 }
 0x7ac   :  { %938 = vmatpush3.bf16.msra.mxu1 %v1166_v1  ;;  %953 = vmatprep.mubr.msk.bf16.mxu1 %vm1109_vm0, %v1108_v0  ;;  %v422_v1 = vld [vmem:[#allocation2 + $0x28] sm:$0xff] }
 0x7ad   :  { %939 = vmatprep.subr.bf16.mxu1 %v1108_v0 }
 0x7b0   :  { %940 = vmatpush3.bf16.msra.mxu1 %v1169_v2 }
 0x7b1   :  { %941 = vmatprep.subr.bf16.mxu1 %v1108_v0 }
 0x7b4   :  { %942 = vmatpush3.bf16.msra.mxu1 %v1175_v3 }
 0x7b5   :  { %943 = vmatprep.subr.bf16.mxu1 %v1108_v0 }
 0x7b8   :  { %944 = vmatpush3.bf16.msra.mxu1 %v1181_v4 }
 0x7b9   :  { %945 = vmatprep.subr.bf16.mxu1 %v1108_v0 }
 0x7bc   :  { %946 = vmatpush3.bf16.msra.mxu1 %v1187_v5 }
 0x7bd   :  { %947 = vmatprep.subr.bf16.mxu1 %v1108_v0 }
 0x7c0   :  { %948 = vmatpush3.bf16.msra.mxu1 %v1193_v6 }
 0x7c1   :  { %949 = vmatprep.subr.bf16.mxu1 %v1108_v0 }
 0x7c4   :  { %950 = vmatpush3.bf16.msra.mxu1 %v1199_v7 }
 0x7c5   :  { %951 = vmatprep.subr.bf16.mxu1 %v1108_v0 }
 0x7c8   :  { %952 = vmatpush3.bf16.msra.mxu1 %v1205_v8 }
 0x87e   :  { %v458_v2 = vpop.f32.mrb[8].mxu1 }
 0x87f   :  { %v464_v3 = vadd.f32 %v458_v2, %v422_v1  ;;  %v915_v4 = vpop.f32.mrb[9].mxu1 }
 0x880   :  { %v461_v60 = vpop.f32.mrb[10].mxu1 }
 0x881   :  { %v717_v61 = vmul.f32 -1.442695, %v464_v3  ;;  %v916_v62 = vpop.f32.mrb[11].mxu1 }
 0x883   :  { %1012 = vpow2.f32 %v717_v61 }
 0x88d   :  { %v1013_v5 = vpop.eup %1012 }
 0x88e   :  { %v468_v63 = vadd.f32 1.0, %v1013_v5 }
 0x890   :  { %1014 = vrcp.f32 %v468_v63 }
 0x89a   :  { %v1015_v6 = vpop.eup %1014 }
 0x89b   :  { %471 = vrot.lane.b32.xlu0 %v1015_v6, %s1112_s12  ;;  %473 = vrot.lane.b32.xlu1 %v1015_v6, %s1106_s0 }
 0x89f   :  { %477 = vrot.lane.b32.xlu1 %v1015_v6, %s1111_s1 }
 0x90d   :  { %v474_v7 = vpop.permute.xlu1 %473  ;;  %v472_v9 = vpop.permute.xlu0 %471 }
 0x90e   :  { %v475_v8 = vmul.f32 2.0, %v474_v7  ;;  %v479_v11 = vmul.f32 %v472_v9, %v418_v55 }
 0x910   :  { %v718_v10 = vadd.f32 -1.0, %v475_v8 }
 0x911   :  { %v478_v15 = vpop.permute.xlu1 %477 }
 0x912   :  { %v480_v12 = vmul.f32 %v1015_v6, %v718_v10 }
 0x914   :  { %v481_v13 = vadd.f32 %v480_v12, %v479_v11 }
 0x916   :  { %1016 = vtanh.f32 %v481_v13 }
 0x920   :  { %v1017_v14 = vpop.eup %1016 }
 0x921   :  { %v483_v16 = vmul.f32 %v1017_v14, %v478_v15 }
 0x923   :  { %v486_v17 = vpack.c.bf16 %v483_v16, %v483_v16 }
 0x925   :  { %934 = vmatmul.mubr.bf16.vlgmr.msra.gmra.mrb[12].mxu0 %v486_v17 }
 0x926   :  { %959 = vmatprep.mubr.msk.f32.mxu0 %vm1109_vm0, %v1108_v0 }
 0x9f8   :  { %v521_v19 = vpop.f32.mrb[12].mxu0 }
 0x9f9   :  { %v527_v20 = vadd.f32 %v521_v19, %v485_v18  ;;  %v935_v21 = vpop.f32.mrb[13].mxu0 }
 0x9fa   :  { %v524_v22 = vpop.f32.mrb[14].mxu0 }
 0x9fb   :  { %v719_v23 = vmul.f32 -1.442695, %v527_v20  ;;  %v936_v24 = vpop.f32.mrb[15].mxu0 }
 0x9fd   :  { %1018 = vpow2.f32 %v719_v23 }
 0xa07   :  { %v1019_v25 = vpop.eup %1018 }
 0xa08   :  { %v531_v26 = vadd.f32 1.0, %v1019_v25 }
 0xa0a   :  { %1020 = vrcp.f32 %v531_v26 }
 0xa14   :  { %v1021_v27 = vpop.eup %1020 }
 0xa15   :  { %534 = vrot.lane.b32.xlu1 %v1021_v27, %s1112_s12  ;;  %536 = vrot.lane.b32.xlu0 %v1021_v27, %s1106_s0 }
 0xa19   :  { %540 = vrot.lane.b32.xlu0 %v1021_v27, %s1111_s1 }
 0xa87   :  { %v537_v28 = vpop.permute.xlu0 %536  ;;  %v535_v29 = vpop.permute.xlu1 %534 }
 0xa88   :  { %v538_v0 = vmul.f32 2.0, %v537_v28  ;;  %v542_v31 = vmul.f32 %v535_v29, %v481_v13 }
 0xa8a   :  { %v720_v30 = vadd.f32 -1.0, %v538_v0 }
 0xa8b   :  { %v541_v35 = vpop.permute.xlu0 %540 }
 0xa8c   :  { %v543_v32 = vmul.f32 %v1021_v27, %v720_v30 }
 0xa8e   :  { %v544_v33 = vadd.f32 %v543_v32, %v542_v31 }
 0xa90   :  { %1022 = vtanh.f32 %v544_v33 }
 0xa9a   :  { %v1023_v34 = vpop.eup %1022 }
 0xa9b   :  { %v546_v36 = vmul.f32 %v1023_v34, %v541_v35 }
 0xa9d   :  { %v549_v37 = vpack.c.bf16 %v546_v36, %v546_v36 }
 0xa9f   :  { %954 = vmatmul.mubr.bf16.vlgmr.msra.gmra.mrb[12].mxu1 %v549_v37 }
 0xb72   :  { %v584_v39 = vpop.f32.mrb[12].mxu1 }
 0xb73   :  { %v590_v40 = vadd.f32 %v584_v39, %v548_v38  ;;  %v955_v41 = vpop.f32.mrb[13].mxu1 }
 0xb74   :  { %v587_v42 = vpop.f32.mrb[14].mxu1 }
 0xb75   :  { %v721_v43 = vmul.f32 -1.442695, %v590_v40  ;;  %v956_v44 = vpop.f32.mrb[15].mxu1 }
 0xb77   :  { %1024 = vpow2.f32 %v721_v43 }
 0xb81   :  { %v1025_v45 = vpop.eup %1024 }
 0xb82   :  { %v594_v46 = vadd.f32 1.0, %v1025_v45 }
 0xb84   :  { %1026 = vrcp.f32 %v594_v46 }
 0xb8e   :  { %v1027_v47 = vpop.eup %1026 }
 0xb8f   :  { %597 = vrot.lane.b32.xlu0 %v1027_v47, %s1112_s12  ;;  %599 = vrot.lane.b32.xlu1 %v1027_v47, %s1106_s0 }
 0xb93   :  { %603 = vrot.lane.b32.xlu1 %v1027_v47, %s1111_s1 }
 0xc01   :  { %v600_v48 = vpop.permute.xlu1 %599  ;;  %v598_v50 = vpop.permute.xlu0 %597 }
 0xc02   :  { %v601_v49 = vmul.f32 2.0, %v600_v48  ;;  %v605_v52 = vmul.f32 %v598_v50, %v544_v33 }
 0xc04   :  { %v722_v51 = vadd.f32 -1.0, %v601_v49 }
 0xc05   :  { %v604_v56 = vpop.permute.xlu1 %603 }
 0xc06   :  { %v606_v53 = vmul.f32 %v1027_v47, %v722_v51 }
 0xc08   :  { %v607_v54 = vadd.f32 %v606_v53, %v605_v52 }
 0xc0a   :  { %1028 = vtanh.f32 %v607_v54 }
 0xc14   :  { %v1029_v55 = vpop.eup %1028 }
 0xc15   :  { %v609_v57 = vmul.f32 %v1029_v55, %v604_v56 }
 0xc17   :  { %958 = vmatpush3.xpose.msra.mxu0 %v609_v57 }
 0xc1a   :  { %960 = vmatmul.mubr.f32.vlgmr.msra.gmra.mrb[16].mxu0 %v610_v58 }
 0xced   :  { %v677_v59 = vpop.f32.mrb[16].mxu0 }
 0xcee   :  { %v961_v1 = vpop.f32.mrb[17].mxu0  ;;  %682 = vst.msk [vmem:[#allocation7] sm:$0x1] %vm681_vm1, %v677_v59 }
 0xcef   :  { %1085 = shalt.err (!%p1082_p6)
}
 0xcf0   :  { %s1086_s2 = scalar_lea.hbm %s1365_s3, 16 }
 0xcf1   :  { %p1087_p7 = scmp.ne.s32.totalorder %s1365_s3, %s1086_s2  ;;  %p1090_p8 = scmp.lt.u32.totalorder %s1086_s2, %s1365_s3 }
 0xcf3   :  { %p1092_p9 = pnand %p1090_p8, %p1087_p7 }
 0xcf5   :  { %1095 = shalt.err (!%p1092_p9)
}
 0xcf6   :  { %692 = dma.vmem_to_hbm [thread:$0]  %s690_s16, 16, %s1365_s3, [#allocation4]  }
 0xcf7   :  { %1100 = dma.done.wait [#allocation4], 16  }
 0xcf8   :  { %1101 = vsyncadd [#allocation4], 4294967280 }
 0xcf9   :  { %696 = vsyncpa [#allocation3], 1 }
 0xcfa   :  { %697 = vsyncpa [#allocation6], 1 }
 0xcfb   :  { %698 = vsyncpa [#allocation4], 1 }

</bundles_post_ra>
